<compile_context>
chip_gen: v5e
topology: v5e:2x2
jax: 0.10.0
libtpu: 0.0.40
codegen_flags: <defaults>
</compile_context>

<pallas_src>
import functools

import jax
import jax.numpy as jnp
from jax.experimental import pallas as pl
from jax.experimental.pallas import tpu as pltpu

ACTION_DIM = 8            # synthetic order_status_dim from Vrp_Env
_LANES = 128
_MAX_TILE_ROWS = 2048     # (2048, 128) f32 block = 1 MiB (2 MiB double-buffered)


def _round_up(x, m):
    return ((x + m - 1) // m) * m


# ---------------------------------------------------------------------------
# One-off pltpu.roll direction probe (host-side, cached).  The segmented
# reduction only needs to know which lane of each group holds the full-group
# result, which depends on the rotate direction; resolving it with a trivial
# kernel keeps the main kernel correct under either convention.
# ---------------------------------------------------------------------------
def _probe_roll_kernel(x_ref, o_ref):
    o_ref[...] = pltpu.roll(x_ref[...], 1, axis=1)


@functools.lru_cache(maxsize=None)
def _roll_fetches_lower_lane() -> bool:
    """True iff pltpu.roll(x, s, axis)[..., i] == x[..., i - s] (jnp.roll style)."""
    x = jnp.broadcast_to(jnp.arange(_LANES, dtype=jnp.float32), (8, _LANES))
    out = pl.pallas_call(
        _probe_roll_kernel,
        out_shape=jax.ShapeDtypeStruct((8, _LANES), jnp.float32),
    )(x)
    first = float(jax.device_get(out)[0, 0])
    if first == float(_LANES - 1):
        return True               # out[i] = x[i - 1]
    if first == 1.0:
        return False              # out[i] = x[i + 1]
    raise RuntimeError(f"unexpected pltpu.roll probe value: {first}")


# ---------------------------------------------------------------------------
# Fused kernel: data_normal_2d01 (per logical row of `action_dim` values) + fc.
#   x_ref block: (tile_r, 128) -- 128/action_dim logical rows packed per lane row
#   wmat (128, g): block-diagonal fc weights  -> S = x @ wmat (per-row weighted sum)
#   sel  (128, g): 0/1 selector picking the valid lane of each group (min/max)
#   scal (2,) SMEM: [sum(fc_w), fc_b]
#   o_ref block: (tile_r, g) -- one fc output per logical row
# ---------------------------------------------------------------------------
def _make_kernel(action_dim):
    shifts = []
    s = action_dim // 2
    while s >= 1:
        shifts.append(s)
        s //= 2

    def kernel(scal_ref, wmat_ref, sel_ref, x_ref, o_ref):
        x = x_ref[...]                                  # (tile_r, 128) f32
        w_sum = scal_ref[0]
        bias = scal_ref[1]

        # Segmented min/max over each group of `action_dim` lanes: rotate tree
        # (XLU) with the first rotate shared between the min and max trees.
        r = pltpu.roll(x, shifts[0], axis=1)
        mn = jnp.minimum(x, r)
        mx = jnp.maximum(x, r)
        for sh in shifts[1:]:
            mn = jnp.minimum(mn, pltpu.roll(mn, sh, axis=1))
            mx = jnp.maximum(mx, pltpu.roll(mx, sh, axis=1))

        # Compact the valid lane of each group to a dense (tile_r, g) slab and
        # fold the fc weights into the row reduction, all via small matmuls
        # (the MXU is otherwise idle).  Cross-group lanes of mn/mx are finite,
        # so multiplying them by the selector's zeros is exact.
        sel = sel_ref[...]
        mn_c = jnp.dot(mn, sel, preferred_element_type=jnp.float32)
        mx_c = jnp.dot(mx, sel, preferred_element_type=jnp.float32)
        s_c = jnp.dot(x, wmat_ref[...], preferred_element_type=jnp.float32)

        # data_normal_2d01 folded into the linear layer:
        #   normal row:     sum_j w_j*(x_j - mn)/dst   = (S - mn*W)/dst
        #   zero-range row: sum_j w_j*(x_j + shift)/2  = (S + shift*W)/2
        dst = mx_c - mn_c
        degen = dst == 0.0
        safe = jnp.where(degen, 1.0, dst)
        shift_amt = jnp.maximum(-mn_c, 0.0)
        val = jnp.where(degen,
                        0.5 * (s_c + shift_amt * w_sum),
                        (s_c - mn_c * w_sum) / safe) + bias
        o_ref[...] = val.astype(o_ref.dtype)

    return kernel


def _choose_tile_rows(total_rows):
    if total_rows <= 16:
        return total_rows                          # single full-extent block
    tile = _round_up((total_rows + 7) // 8, 8)     # aim for ~8 grid steps
    return max(8, min(tile, _MAX_TILE_ROWS))


def value_net_fused(x_rows, fc_w, fc_b):
    """x_rows: (N, action_dim) f32. Returns (N, 1) = Linear(data_normal rows)."""
    n, L = x_rows.shape
    if L < 2 or (_LANES % L) != 0 or (L & (L - 1)):
        # TODO(synk): generalize the lane-group reduction to action_dim values
        # that are not a power of two dividing 128.
        raise NotImplementedError("action_dim must be a power of two dividing 128")
    g = _LANES // L                                # logical rows per 128-lane row

    # Pack rows onto the lane axis with a free (contiguous) reshape; pad the
    # row count only up to the packing granularity (>= 8 packed rows).
    n_pad = max(_round_up(n, g), 8 * g)
    if n_pad != n:
        x_rows = jnp.pad(x_rows, ((0, n_pad - n), (0, 0)))
    rows = (n_pad * L) // _LANES
    xp = x_rows.reshape(rows, _LANES)              # no data movement

    tile_r = _choose_tile_rows(rows)
    grid = (pl.cdiv(rows, tile_r),)                # partial last block allowed

    fc_w = fc_w.astype(jnp.float32).reshape(L)
    offset = (L - 1) if _roll_fetches_lower_lane() else 0
    lane_idx = jnp.arange(_LANES)
    wmat = jnp.zeros((_LANES, g), jnp.float32).at[
        lane_idx, lane_idx // L].set(jnp.tile(fc_w, g))
    sel = jnp.zeros((_LANES, g), jnp.float32).at[
        jnp.arange(g) * L + offset, jnp.arange(g)].set(1.0)
    scal = jnp.stack([jnp.sum(fc_w), fc_b.reshape(())]).astype(jnp.float32)

    out = pl.pallas_call(
        _make_kernel(L),
        out_shape=jax.ShapeDtypeStruct((rows, g), jnp.float32),
        grid=grid,
        in_specs=[
            pl.BlockSpec(memory_space=pltpu.MemorySpace.SMEM),     # [sum(w), b]
            pl.BlockSpec((_LANES, g), lambda i: (0, 0)),           # wmat
            pl.BlockSpec((_LANES, g), lambda i: (0, 0)),           # selector
            pl.BlockSpec((tile_r, _LANES), lambda i: (i, 0)),      # activations
        ],
        out_specs=pl.BlockSpec((tile_r, g), lambda i: (i, 0)),
        compiler_params=pltpu.CompilerParams(
            dimension_semantics=("parallel",),       # shards across v7x's 2 TCs
            vmem_limit_bytes=32 * 1024 * 1024,       # ample headroom, blocks are KB-MB
        ),
    )(scal, wmat, sel, xp)
    return out.reshape(-1)[:n].reshape(n, 1)


# ---------------------------------------------------------------------------
# ValueNet forward
# ---------------------------------------------------------------------------
def init_value_net_params(key, action_dim=ACTION_DIM):
    # torch.nn.Linear(action_dim, 1) default init: U(-1/sqrt(in), 1/sqrt(in))
    kw, kb = jax.random.split(key)
    bound = 1.0 / (float(action_dim) ** 0.5)
    fc_w = jax.random.uniform(kw, (action_dim,), jnp.float32, -bound, bound)
    fc_b = jax.random.uniform(kb, (1,), jnp.float32, -bound, bound)
    return {"fc_w": fc_w, "fc_b": fc_b}


def value_net_forward(params, x0, x1, x2, actions):
    # x1/x2 normalization and trg = cat([x1, x2, actions], 1) do not affect the
    # returned value (trg is unused; the Transformer stand-in consumes x0 only).
    # TODO(synk): normalize x1/x2 and feed Transformer(x0n, x1n, x2n) once the
    # Transformer definition is available.
    del x1, x2, actions
    L = x0.shape[-1]
    return value_net_fused(x0.reshape(-1, L), params["fc_w"], params["fc_b"])


# ---------------------------------------------------------------------------
# Pure-JAX reference for correctness checking.
# ---------------------------------------------------------------------------
def _ref_forward(params, x0):
    x = x0.reshape(-1, x0.shape[-1]).astype(jnp.float32)
    mn = x.min(axis=1, keepdims=True)
    mx = x.max(axis=1, keepdims=True)
    shift = jnp.maximum(-mn, 0.0)
    dst = mx - mn
    safe = jnp.where(dst == 0.0, 1.0, dst)
    y = jnp.where(dst == 0.0, (x + shift) * 0.5, (x - mn) / safe)
    return y @ params["fc_w"].reshape(-1, 1) + params["fc_b"].reshape(1, 1)


if __name__ == "__main__":
    key = jax.random.PRNGKey(0)
    k0, k1, k2, ka, kp = jax.random.split(key, 5)

    B, C, L = 2, 4, ACTION_DIM                    # small synthetic shapes
    x0 = jax.random.normal(k0, (B, C, L), jnp.float32)
    x1 = jax.random.normal(k1, (B, C, L), jnp.float32)
    x2 = jax.random.normal(k2, (B, C, L), jnp.float32)
    actions = jax.random.normal(ka, (B, 2, L), jnp.float32)
    params = init_value_net_params(kp)

    out = jax.block_until_ready(value_net_forward(params, x0, x1, x2, actions))
    assert out.shape == (B * C, 1), out.shape
    ref = _ref_forward(params, x0)
    assert jnp.allclose(out, ref, atol=1e-2, rtol=1e-2), (out, ref)

    # Larger check: multi-step grid with a partial last block, plus rows that
    # exercise the zero-range (dst == 0) branch.
    xb = jax.random.normal(jax.random.PRNGKey(1), (8, 130, ACTION_DIM), jnp.float32)
    xb = xb.at[0, 0].set(1.7)      # constant positive row
    xb = xb.at[3, 5].set(-0.3)     # constant negative row (shift path)
    out_b = jax.block_until_ready(value_net_forward(params, xb, xb, xb, actions))
    ref_b = _ref_forward(params, xb)
    assert out_b.shape == (8 * 130, 1), out_b.shape
    assert jnp.allclose(out_b, ref_b, atol=1e-2, rtol=1e-2)

    print("KERNEL_OK")
</pallas_src>

<mosaic_0001>
module attributes {stable_mosaic.version = 11 : i64} {
  func.func @_probe_roll_kernel(%arg0: memref<8x128xf32, #tpu.memory_space<vmem>>, %arg1: memref<8x128xf32, #tpu.memory_space<vmem>>) attributes {dimension_semantics = [], scalar_prefetch = 0 : i64, scratch_operands = 0 : i64, tpu.core_type = #tpu.core_type<tc>} {
    %c0 = arith.constant 0 : index
    %c0_0 = arith.constant 0 : index
    %0 = vector.load %arg0[%c0, %c0_0] : memref<8x128xf32, #tpu.memory_space<vmem>>, vector<8x128xf32>
    %c1_i32 = arith.constant 1 : i32
    %1 = tpu.dynamic_rotate %0 by %c1_i32 dim 1 : vector<8x128xf32>, i32 -> vector<8x128xf32>
    %c0_1 = arith.constant 0 : index
    %c0_2 = arith.constant 0 : index
    %2 = vector.load %arg1[%c0_1, %c0_2] : memref<8x128xf32, #tpu.memory_space<vmem>>, vector<8x128xf32>
    tpu.vector_store %arg1[%c0_1, %c0_2], %1 {strides = array<i32>} : memref<8x128xf32, #tpu.memory_space<vmem>>, vector<8x128xf32>,
    return
  }
}

</mosaic_0001>

<bundles_post_ra>
// kernel: tpu_custom_call.1
= control target key start
LH: loop header
LB: loop body
LE: loop exit
PB: predicated region body
PF: predicated region fallthrough
CT: control target
= control target key end

     0   :  { %6 = vsyncpa [#allocation3], 0  ;;  %s118_s0 = inlined_call_operand.hbm [shape: f32[8,128], index: 0, kind: input, shape index: {}]   ;;  %s119_s1 = inlined_call_operand.hbm [shape: f32[8,128], index: 1, kind: output, shape index: {}]  }
   0x1   :  { %7 = vsyncpa [#allocation4], 0  ;;  %s13_s8 = sshll.u32 %s118_s0, 4  ;;  %s99_s9 = smov [#allocation2]   ;;  %s14_s8 = int_to_ptr.hbm [resolvable:$true] %s13_s8 }
   0x2   :  { %s15_s10 = sshll.u32 %s99_s9, 4  ;;  %s16_s10 = int_to_ptr.vmem [resolvable:$true] %s15_s10 }
   0x3   :  { %18 = dma.hbm_to_vmem [thread:$0]  %s14_s8, 128, %s16_s10, [#allocation3]  }
   0x4   :  { %95 = dma.done.wait [#allocation3], 128  }
   0x5   :  { %96 = vsyncadd [#allocation3], 4294967168  ;;  %v23_v0 = vld [vmem:[#allocation2] sm:$0xff]  ;;  %s100_s11 = smov 1   ;;  %s101_s12 = smov [#allocation5]  }
   0x6   :  { %24 = vrot.lane.b32.xlu0 %v23_v0, %s100_s11  ;;  %s32_s13 = sshll.u32 %s101_s12, 4  ;;  %s34_s16 = sshll.u32 %s119_s1, 4  ;;  %s33_s13 = int_to_ptr.vmem [resolvable:$true] %s32_s13  ;;  %s35_s16 = int_to_ptr.hbm [resolvable:$true] %s34_s16 }
  0x78   :  { %v25_v1 = vpop.permute.xlu0 %24 }
  0x79   :  { %26 = vst [vmem:[#allocation5] sm:$0xff] %v25_v1 }
  0x7a   :  { %37 = dma.vmem_to_hbm [thread:$0]  %s33_s13, 128, %s35_s16, [#allocation4]  }
  0x7b   :  { %97 = dma.done.wait [#allocation4], 128  }
  0x7c   :  { %98 = vsyncadd [#allocation4], 4294967168 }
  0x7d   :  { %42 = vsyncpa [#allocation3], 1 }
  0x7e   :  { %43 = vsyncpa [#allocation4], 1 }

</bundles_post_ra>
